<compile_context>
chip_gen: v7x
topology: tpu7x:2x2x1
jax: 0.10.0
libtpu: 0.0.40
codegen_flags: <defaults>
</compile_context>

<pallas_src>
import functools

import jax
import jax.numpy as jnp
from jax.experimental import pallas as pl
from jax.experimental.pallas import tpu as pltpu


# ----------------------------------------------------------------------------
# Pallas kernel: whole (lane-stacked) batch in one step.
# ----------------------------------------------------------------------------
def _basic_block_kernel(x_ref, w1_ref, b1_ref, w2_ref, b2_ref, mask_ref,
                        *rest, width, emit_preact):
    if emit_preact:
        out_ref, pre_ref, stk_ref = rest
    else:
        out_ref, stk_ref = rest
        pre_ref = None

    x = x_ref[...]                               # (C, N*HW) f32
    nhw = x.shape[1]

    def conv3x3(inp, w_ref):
        """One GEMM: (Cout, 9*Cin)bf16 @ (9*Cin, N*HW)bf16 -> (Cout, N*HW)f32."""
        c = inp.shape[0]
        for k in range(9):                       # static, fully unrolled
            dy, dx = divmod(k, 3)
            off = (dy - 1) * width + (dx - 1)    # source pixel = dest + off
            if off == 0:                         # center tap: no shift needed
                piece = inp
            else:
                piece = pltpu.roll(inp, (-off) % nhw, axis=1)   # XLU lane roll
            stk_ref[k * c:(k + 1) * c, :] = piece
        # Single mask multiply (f32, v5e-friendly) + single bf16 cast.
        stacked = (stk_ref[...] * mask_ref[...]).astype(jnp.bfloat16)
        return jnp.dot(w_ref[...], stacked, preferred_element_type=jnp.float32)

    # conv1 + bn1 (scale folded into w1, bias here) + relu
    out1 = jnp.maximum(conv3x3(x, w1_ref) + b1_ref[...], 0.0)
    # conv2 + bn2 + identity shortcut (residual uses f32 input)
    pre = conv3x3(out1, w2_ref) + b2_ref[...] + x
    out_ref[...] = jnp.maximum(pre, 0.0)
    if emit_preact:
        pre_ref[...] = pre


# ----------------------------------------------------------------------------
# Host-side folding helpers (run ONCE, outside the per-call jit path)
# ----------------------------------------------------------------------------
def _fold_bn(gamma, beta, mean, var, eps=1e-5):
    scale = gamma / jnp.sqrt(var + eps)
    return scale, beta - mean * scale


def _fold_weight(w_oihw, scale):
    """(Cout,Cin,3,3) * per-Cout BN scale -> (Cout, 9*Cin) bf16.

    Column order is k*Cin + cin with k = dy*3 + dx, matching the kernel's
    stacked-operand row order.
    """
    w = w_oihw * scale[:, None, None, None]
    cout, cin = w.shape[0], w.shape[1]
    return jnp.transpose(w, (0, 2, 3, 1)).reshape(cout, 9 * cin).astype(jnp.bfloat16)


def _border_mask(n, cin, h, w):
    """(9*Cin, N*H*W) f32: 1 where tap k=(dy,dx) reads inside its own image."""
    p = jnp.arange(h * w)
    py, px = p // w, p % w
    rows = []
    for dy in range(3):
        for dx in range(3):
            sy, sx = py + dy - 1, px + dx - 1
            rows.append((sy >= 0) & (sy < h) & (sx >= 0) & (sx < w))
    m = jnp.stack(rows).astype(jnp.float32)      # (9, HW)
    m = jnp.tile(m, (1, n))                      # (9, N*HW): images along lanes
    return jnp.repeat(m, cin, axis=0)            # (9*Cin, N*HW): k-major rows


def prepare_folded(params, n, h, w, eps=1e-5):
    """Fold BN into conv weights/biases and build the padding mask (once)."""
    (w1, g1, b1, m1, v1, w2, g2, b2, m2, v2) = params
    cout, cin = w1.shape[0], w1.shape[1]
    assert cin == cout, "this instantiation uses the identity shortcut"
    s1, bb1 = _fold_bn(g1, b1, m1, v1, eps)
    s2, bb2 = _fold_bn(g2, b2, m2, v2, eps)
    return (
        _fold_weight(w1, s1),                        # (Cout, 9*Cin)  bf16
        bb1.reshape(cout, 1).astype(jnp.float32),    # (Cout, 1)      f32
        _fold_weight(w2, s2),                        # (Cout, 9*Cout) bf16
        bb2.reshape(cout, 1).astype(jnp.float32),    # (Cout, 1)      f32
        _border_mask(n, cin, h, w),                  # (9*Cin, N*HW)  f32
    )


# ----------------------------------------------------------------------------
# Forward pass
# ----------------------------------------------------------------------------
@functools.partial(jax.jit, static_argnames=("is_last",))
def basic_block_forward(x_nchw, folded, is_last=False):
    """BasicBlock forward (stride=1, identity shortcut), NCHW in / NCHW out."""
    w1f, b1c, w2f, b2c, mask = folded
    n, c, h, w = x_nchw.shape
    cout = w1f.shape[0]
    nhw = n * h * w

    # Stack images along lanes: (C, N*H*W) = (4, 512), lane-dense everywhere.
    x = jnp.transpose(x_nchw, (1, 0, 2, 3)).reshape(c, nhw).astype(jnp.float32)

    kernel = functools.partial(_basic_block_kernel, width=w, emit_preact=is_last)
    full = lambda shp: pl.BlockSpec(shp, lambda i: (0,) * len(shp))

    act_out = jax.ShapeDtypeStruct((cout, nhw), jnp.float32)
    if is_last:
        out_shape = (act_out, act_out)
        out_specs = (full((cout, nhw)), full((cout, nhw)))
    else:
        out_shape = act_out
        out_specs = full((cout, nhw))

    outs = pl.pallas_call(
        kernel,
        out_shape=out_shape,
        grid=(1,),
        in_specs=[
            full((c, nhw)),          # x            f32
            full((cout, 9 * c)),     # w1 folded    bf16
            full((cout, 1)),         # bn1 bias     f32
            full((cout, 9 * cout)),  # w2 folded    bf16
            full((cout, 1)),         # bn2 bias     f32
            full((9 * c, nhw)),      # border mask  f32
        ],
        out_specs=out_specs,
        scratch_shapes=[pltpu.VMEM((9 * c, nhw), jnp.float32)],
        compiler_params=pltpu.CompilerParams(dimension_semantics=("arbitrary",)),
    )(x, w1f, b1c, w2f, b2c, mask)

    def to_nchw(y):
        return jnp.transpose(y.reshape(cout, n, h, w), (1, 0, 2, 3))

    if is_last:
        return to_nchw(outs[0]), to_nchw(outs[1])
    return to_nchw(outs)


# ----------------------------------------------------------------------------
# Pure-JAX reference (for correctness check)
# ----------------------------------------------------------------------------
def basic_block_ref(x, params, is_last=False, eps=1e-5):
    (w1, g1, b1, m1, v1, w2, g2, b2, m2, v2) = params

    def conv(x, w):
        return jax.lax.conv_general_dilated(
            x, w, window_strides=(1, 1), padding=((1, 1), (1, 1)),
            dimension_numbers=("NCHW", "OIHW", "NCHW"))

    def bn(y, g, b, m, v):
        s = g / jnp.sqrt(v + eps)
        return y * s[None, :, None, None] + (b - m * s)[None, :, None, None]

    out = jax.nn.relu(bn(conv(x, w1), g1, b1, m1, v1))
    pre = bn(conv(out, w2), g2, b2, m2, v2) + x          # identity shortcut
    out = jax.nn.relu(pre)
    return (out, pre) if is_last else out


# ----------------------------------------------------------------------------
# Main
# ----------------------------------------------------------------------------
if __name__ == "__main__":
    key = jax.random.PRNGKey(0)
    ks = jax.random.split(key, 11)

    N, C, H, W = 2, 4, 16, 16          # in_planes = planes = 4, stride = 1
    planes = C

    x = jax.random.normal(ks[0], (N, C, H, W), jnp.float32)

    w1 = jax.random.normal(ks[1], (planes, C, 3, 3), jnp.float32) * 0.1
    g1 = 1.0 + 0.1 * jax.random.normal(ks[2], (planes,), jnp.float32)
    b1 = 0.1 * jax.random.normal(ks[3], (planes,), jnp.float32)
    m1 = 0.1 * jax.random.normal(ks[4], (planes,), jnp.float32)
    v1 = 0.9 + 0.1 * jnp.abs(jax.random.normal(ks[5], (planes,), jnp.float32))

    w2 = jax.random.normal(ks[6], (planes, planes, 3, 3), jnp.float32) * 0.1
    g2 = 1.0 + 0.1 * jax.random.normal(ks[7], (planes,), jnp.float32)
    b2 = 0.1 * jax.random.normal(ks[8], (planes,), jnp.float32)
    m2 = 0.1 * jax.random.normal(ks[9], (planes,), jnp.float32)
    v2 = 0.9 + 0.1 * jnp.abs(jax.random.normal(ks[10], (planes,), jnp.float32))

    params = (w1, g1, b1, m1, v1, w2, g2, b2, m2, v2)

    # Host-side BN/weight folding + mask construction: done ONCE, off the hot path.
    folded = jax.block_until_ready(prepare_folded(params, N, H, W))

    # is_last=False (module default): single ReLU'd output.
    out = jax.block_until_ready(basic_block_forward(x, folded, is_last=False))
    ref = basic_block_ref(x, params, is_last=False)
    assert out.shape == (N, C, H, W), out.shape
    # bf16 MXU operands with f32 accumulation -> loosened tolerance.
    assert jnp.allclose(out, ref, atol=5e-2, rtol=5e-2), (
        float(jnp.max(jnp.abs(out - ref))))

    # is_last=True: (out, preact).
    out2, pre2 = jax.block_until_ready(
        basic_block_forward(x, folded, is_last=True))
    ref_out, ref_pre = basic_block_ref(x, params, is_last=True)
    assert jnp.allclose(out2, ref_out, atol=5e-2, rtol=5e-2), (
        float(jnp.max(jnp.abs(out2 - ref_out))))
    assert jnp.allclose(pre2, ref_pre, atol=5e-2, rtol=5e-2), (
        float(jnp.max(jnp.abs(pre2 - ref_pre))))

    print("KERNEL_OK")
</pallas_src>

<mosaic_0001>
module attributes {stable_mosaic.version = 11 : i64} {
  func.func @_basic_block_kernel(%arg0: i32, %arg1: memref<4x512xf32, #tpu.memory_space<vmem>>, %arg2: memref<4x36xbf16, #tpu.memory_space<vmem>>, %arg3: memref<4x1xf32, #tpu.memory_space<vmem>>, %arg4: memref<4x36xbf16, #tpu.memory_space<vmem>>, %arg5: memref<4x1xf32, #tpu.memory_space<vmem>>, %arg6: memref<36x512xf32, #tpu.memory_space<vmem>>, %arg7: memref<4x512xf32, #tpu.memory_space<vmem>>, %arg8: memref<36x512xf32, #tpu.memory_space<vmem>>) attributes {dimension_semantics = [#tpu.dimension_semantics<arbitrary>], iteration_bounds = array<i64: 1>, scalar_prefetch = 0 : i64, scratch_operands = 1 : i64, tpu.core_type = #tpu.core_type<tc>, window_params = [{pipeline_mode = #tpu.pipeline_mode<synchronous>, transform_indices = @transform_0, window_bounds = array<i64: 4, 512>}, {pipeline_mode = #tpu.pipeline_mode<synchronous>, transform_indices = @transform_1, window_bounds = array<i64: 4, 36>}, {pipeline_mode = #tpu.pipeline_mode<synchronous>, transform_indices = @transform_2, window_bounds = array<i64: 4, 1>}, {pipeline_mode = #tpu.pipeline_mode<synchronous>, transform_indices = @transform_3, window_bounds = array<i64: 4, 36>}, {pipeline_mode = #tpu.pipeline_mode<synchronous>, transform_indices = @transform_4, window_bounds = array<i64: 4, 1>}, {pipeline_mode = #tpu.pipeline_mode<synchronous>, transform_indices = @transform_5, window_bounds = array<i64: 36, 512>}, {pipeline_mode = #tpu.pipeline_mode<synchronous>, transform_indices = @transform_6, window_bounds = array<i64: 4, 512>}]} {
    %c0 = arith.constant 0 : index
    %c0_0 = arith.constant 0 : index
    %0 = vector.load %arg1[%c0, %c0_0] : memref<4x512xf32, #tpu.memory_space<vmem>>, vector<4x512xf32>
    %c17_i32 = arith.constant 17 : i32
    %1 = tpu.dynamic_rotate %0 by %c17_i32 dim 1 : vector<4x512xf32>, i32 -> vector<4x512xf32>
    %c0_1 = arith.constant 0 : index
    %c0_2 = arith.constant 0 : index
    %2 = vector.load %arg8[%c0_1, %c0_2] : memref<36x512xf32, #tpu.memory_space<vmem>>, vector<4x512xf32>
    tpu.vector_store %arg8[%c0_1, %c0_2], %1 {strides = array<i32>} : memref<36x512xf32, #tpu.memory_space<vmem>>, vector<4x512xf32>,
    %c16_i32 = arith.constant 16 : i32
    %3 = tpu.dynamic_rotate %0 by %c16_i32 dim 1 : vector<4x512xf32>, i32 -> vector<4x512xf32>
    %c4 = arith.constant 4 : index
    %c0_3 = arith.constant 0 : index
    %4 = vector.load %arg8[%c4, %c0_3] : memref<36x512xf32, #tpu.memory_space<vmem>>, vector<4x512xf32>
    tpu.vector_store %arg8[%c4, %c0_3], %3 {strides = array<i32>} : memref<36x512xf32, #tpu.memory_space<vmem>>, vector<4x512xf32>,
    %c15_i32 = arith.constant 15 : i32
    %5 = tpu.dynamic_rotate %0 by %c15_i32 dim 1 : vector<4x512xf32>, i32 -> vector<4x512xf32>
    %c8 = arith.constant 8 : index
    %c0_4 = arith.constant 0 : index
    %6 = vector.load %arg8[%c8, %c0_4] : memref<36x512xf32, #tpu.memory_space<vmem>>, vector<4x512xf32>
    tpu.vector_store %arg8[%c8, %c0_4], %5 {strides = array<i32>} : memref<36x512xf32, #tpu.memory_space<vmem>>, vector<4x512xf32>,
    %c1_i32 = arith.constant 1 : i32
    %7 = tpu.dynamic_rotate %0 by %c1_i32 dim 1 : vector<4x512xf32>, i32 -> vector<4x512xf32>
    %c12 = arith.constant 12 : index
    %c0_5 = arith.constant 0 : index
    %8 = vector.load %arg8[%c12, %c0_5] : memref<36x512xf32, #tpu.memory_space<vmem>>, vector<4x512xf32>
    tpu.vector_store %arg8[%c12, %c0_5], %7 {strides = array<i32>} : memref<36x512xf32, #tpu.memory_space<vmem>>, vector<4x512xf32>,
    %c16 = arith.constant 16 : index
    %c0_6 = arith.constant 0 : index
    %9 = vector.load %arg8[%c16, %c0_6] : memref<36x512xf32, #tpu.memory_space<vmem>>, vector<4x512xf32>
    tpu.vector_store %arg8[%c16, %c0_6], %0 {strides = array<i32>} : memref<36x512xf32, #tpu.memory_space<vmem>>, vector<4x512xf32>,
    %c511_i32 = arith.constant 511 : i32
    %10 = tpu.dynamic_rotate %0 by %c511_i32 dim 1 : vector<4x512xf32>, i32 -> vector<4x512xf32>
    %c20 = arith.constant 20 : index
    %c0_7 = arith.constant 0 : index
    %11 = vector.load %arg8[%c20, %c0_7] : memref<36x512xf32, #tpu.memory_space<vmem>>, vector<4x512xf32>
    tpu.vector_store %arg8[%c20, %c0_7], %10 {strides = array<i32>} : memref<36x512xf32, #tpu.memory_space<vmem>>, vector<4x512xf32>,
    %c497_i32 = arith.constant 497 : i32
    %12 = tpu.dynamic_rotate %0 by %c497_i32 dim 1 : vector<4x512xf32>, i32 -> vector<4x512xf32>
    %c24 = arith.constant 24 : index
    %c0_8 = arith.constant 0 : index
    %13 = vector.load %arg8[%c24, %c0_8] : memref<36x512xf32, #tpu.memory_space<vmem>>, vector<4x512xf32>
    tpu.vector_store %arg8[%c24, %c0_8], %12 {strides = array<i32>} : memref<36x512xf32, #tpu.memory_space<vmem>>, vector<4x512xf32>,
    %c496_i32 = arith.constant 496 : i32
    %14 = tpu.dynamic_rotate %0 by %c496_i32 dim 1 : vector<4x512xf32>, i32 -> vector<4x512xf32>
    %c28 = arith.constant 28 : index
    %c0_9 = arith.constant 0 : index
    %15 = vector.load %arg8[%c28, %c0_9] : memref<36x512xf32, #tpu.memory_space<vmem>>, vector<4x512xf32>
    tpu.vector_store %arg8[%c28, %c0_9], %14 {strides = array<i32>} : memref<36x512xf32, #tpu.memory_space<vmem>>, vector<4x512xf32>,
    %c495_i32 = arith.constant 495 : i32
    %16 = tpu.dynamic_rotate %0 by %c495_i32 dim 1 : vector<4x512xf32>, i32 -> vector<4x512xf32>
    %c32 = arith.constant 32 : index
    %c0_10 = arith.constant 0 : index
    %17 = vector.load %arg8[%c32, %c0_10] : memref<36x512xf32, #tpu.memory_space<vmem>>, vector<4x512xf32>
    tpu.vector_store %arg8[%c32, %c0_10], %16 {strides = array<i32>} : memref<36x512xf32, #tpu.memory_space<vmem>>, vector<4x512xf32>,
    %c0_11 = arith.constant 0 : index
    %c0_12 = arith.constant 0 : index
    %18 = vector.load %arg8[%c0_11, %c0_12] : memref<36x512xf32, #tpu.memory_space<vmem>>, vector<36x512xf32>
    %c0_13 = arith.constant 0 : index
    %c0_14 = arith.constant 0 : index
    %19 = vector.load %arg6[%c0_13, %c0_14] : memref<36x512xf32, #tpu.memory_space<vmem>>, vector<36x512xf32>
    %20 = arith.mulf %18, %19 : vector<36x512xf32>
    %21 = arith.truncf %20 : vector<36x512xf32> to vector<36x512xbf16>
    %c0_15 = arith.constant 0 : index
    %c0_16 = arith.constant 0 : index
    %22 = vector.load %arg2[%c0_15, %c0_16] : memref<4x36xbf16, #tpu.memory_space<vmem>>, vector<4x36xbf16>
    %cst = arith.constant dense<0.000000e+00> : vector<4x512xf32>
    %23 = tpu.matmul %22, %21, %cst {dimension_numbers = #tpu.dot_dimension_numbers<[1], [0], [0], [1], [0, 0, 1, 1], [], []>} : vector<4x36xbf16>, vector<36x512xbf16>, vector<4x512xf32> -> vector<4x512xf32>
    %c0_17 = arith.constant 0 : index
    %c0_18 = arith.constant 0 : index
    %24 = vector.load %arg3[%c0_17, %c0_18] : memref<4x1xf32, #tpu.memory_space<vmem>>, vector<4x1xf32>
    %25 = vector.broadcast %24 : vector<4x1xf32> to vector<4x512xf32>
    %26 = arith.addf %23, %25 : vector<4x512xf32>
    %cst_19 = arith.constant 0.000000e+00 : f32
    %27 = vector.broadcast %cst_19 : f32 to vector<4x512xf32>
    %28 = arith.maximumf %26, %27 : vector<4x512xf32>
    %c17_i32_20 = arith.constant 17 : i32
    %29 = tpu.dynamic_rotate %28 by %c17_i32_20 dim 1 : vector<4x512xf32>, i32 -> vector<4x512xf32>
    %c0_21 = arith.constant 0 : index
    %c0_22 = arith.constant 0 : index
    %30 = vector.load %arg8[%c0_21, %c0_22] : memref<36x512xf32, #tpu.memory_space<vmem>>, vector<4x512xf32>
    tpu.vector_store %arg8[%c0_21, %c0_22], %29 {strides = array<i32>} : memref<36x512xf32, #tpu.memory_space<vmem>>, vector<4x512xf32>,
    %c16_i32_23 = arith.constant 16 : i32
    %31 = tpu.dynamic_rotate %28 by %c16_i32_23 dim 1 : vector<4x512xf32>, i32 -> vector<4x512xf32>
    %c4_24 = arith.constant 4 : index
    %c0_25 = arith.constant 0 : index
    %32 = vector.load %arg8[%c4_24, %c0_25] : memref<36x512xf32, #tpu.memory_space<vmem>>, vector<4x512xf32>
    tpu.vector_store %arg8[%c4_24, %c0_25], %31 {strides = array<i32>} : memref<36x512xf32, #tpu.memory_space<vmem>>, vector<4x512xf32>,
    %c15_i32_26 = arith.constant 15 : i32
    %33 = tpu.dynamic_rotate %28 by %c15_i32_26 dim 1 : vector<4x512xf32>, i32 -> vector<4x512xf32>
    %c8_27 = arith.constant 8 : index
    %c0_28 = arith.constant 0 : index
    %34 = vector.load %arg8[%c8_27, %c0_28] : memref<36x512xf32, #tpu.memory_space<vmem>>, vector<4x512xf32>
    tpu.vector_store %arg8[%c8_27, %c0_28], %33 {strides = array<i32>} : memref<36x512xf32, #tpu.memory_space<vmem>>, vector<4x512xf32>,
    %c1_i32_29 = arith.constant 1 : i32
    %35 = tpu.dynamic_rotate %28 by %c1_i32_29 dim 1 : vector<4x512xf32>, i32 -> vector<4x512xf32>
    %c12_30 = arith.constant 12 : index
    %c0_31 = arith.constant 0 : index
    %36 = vector.load %arg8[%c12_30, %c0_31] : memref<36x512xf32, #tpu.memory_space<vmem>>, vector<4x512xf32>
    tpu.vector_store %arg8[%c12_30, %c0_31], %35 {strides = array<i32>} : memref<36x512xf32, #tpu.memory_space<vmem>>, vector<4x512xf32>,
    %c16_32 = arith.constant 16 : index
    %c0_33 = arith.constant 0 : index
    %37 = vector.load %arg8[%c16_32, %c0_33] : memref<36x512xf32, #tpu.memory_space<vmem>>, vector<4x512xf32>
    tpu.vector_store %arg8[%c16_32, %c0_33], %28 {strides = array<i32>} : memref<36x512xf32, #tpu.memory_space<vmem>>, vector<4x512xf32>,
    %c511_i32_34 = arith.constant 511 : i32
    %38 = tpu.dynamic_rotate %28 by %c511_i32_34 dim 1 : vector<4x512xf32>, i32 -> vector<4x512xf32>
    %c20_35 = arith.constant 20 : index
    %c0_36 = arith.constant 0 : index
    %39 = vector.load %arg8[%c20_35, %c0_36] : memref<36x512xf32, #tpu.memory_space<vmem>>, vector<4x512xf32>
    tpu.vector_store %arg8[%c20_35, %c0_36], %38 {strides = array<i32>} : memref<36x512xf32, #tpu.memory_space<vmem>>, vector<4x512xf32>,
    %c497_i32_37 = arith.constant 497 : i32
    %40 = tpu.dynamic_rotate %28 by %c497_i32_37 dim 1 : vector<4x512xf32>, i32 -> vector<4x512xf32>
    %c24_38 = arith.constant 24 : index
    %c0_39 = arith.constant 0 : index
    %41 = vector.load %arg8[%c24_38, %c0_39] : memref<36x512xf32, #tpu.memory_space<vmem>>, vector<4x512xf32>
    tpu.vector_store %arg8[%c24_38, %c0_39], %40 {strides = array<i32>} : memref<36x512xf32, #tpu.memory_space<vmem>>, vector<4x512xf32>,
    %c496_i32_40 = arith.constant 496 : i32
    %42 = tpu.dynamic_rotate %28 by %c496_i32_40 dim 1 : vector<4x512xf32>, i32 -> vector<4x512xf32>
    %c28_41 = arith.constant 28 : index
    %c0_42 = arith.constant 0 : index
    %43 = vector.load %arg8[%c28_41, %c0_42] : memref<36x512xf32, #tpu.memory_space<vmem>>, vector<4x512xf32>
    tpu.vector_store %arg8[%c28_41, %c0_42], %42 {strides = array<i32>} : memref<36x512xf32, #tpu.memory_space<vmem>>, vector<4x512xf32>,
    %c495_i32_43 = arith.constant 495 : i32
    %44 = tpu.dynamic_rotate %28 by %c495_i32_43 dim 1 : vector<4x512xf32>, i32 -> vector<4x512xf32>
    %c32_44 = arith.constant 32 : index
    %c0_45 = arith.constant 0 : index
    %45 = vector.load %arg8[%c32_44, %c0_45] : memref<36x512xf32, #tpu.memory_space<vmem>>, vector<4x512xf32>
    tpu.vector_store %arg8[%c32_44, %c0_45], %44 {strides = array<i32>} : memref<36x512xf32, #tpu.memory_space<vmem>>, vector<4x512xf32>,
    %c0_46 = arith.constant 0 : index
    %c0_47 = arith.constant 0 : index
    %46 = vector.load %arg8[%c0_46, %c0_47] : memref<36x512xf32, #tpu.memory_space<vmem>>, vector<36x512xf32>
    %c0_48 = arith.constant 0 : index
    %c0_49 = arith.constant 0 : index
    %47 = vector.load %arg6[%c0_48, %c0_49] : memref<36x512xf32, #tpu.memory_space<vmem>>, vector<36x512xf32>
    %48 = arith.mulf %46, %47 : vector<36x512xf32>
    %49 = arith.truncf %48 : vector<36x512xf32> to vector<36x512xbf16>
    %c0_50 = arith.constant 0 : index
    %c0_51 = arith.constant 0 : index
    %50 = vector.load %arg4[%c0_50, %c0_51] : memref<4x36xbf16, #tpu.memory_space<vmem>>, vector<4x36xbf16>
    %cst_52 = arith.constant dense<0.000000e+00> : vector<4x512xf32>
    %51 = tpu.matmul %50, %49, %cst_52 {dimension_numbers = #tpu.dot_dimension_numbers<[1], [0], [0], [1], [0, 0, 1, 1], [], []>} : vector<4x36xbf16>, vector<36x512xbf16>, vector<4x512xf32> -> vector<4x512xf32>
    %c0_53 = arith.constant 0 : index
    %c0_54 = arith.constant 0 : index
    %52 = vector.load %arg5[%c0_53, %c0_54] : memref<4x1xf32, #tpu.memory_space<vmem>>, vector<4x1xf32>
    %53 = vector.broadcast %52 : vector<4x1xf32> to vector<4x512xf32>
    %54 = arith.addf %51, %53 : vector<4x512xf32>
    %55 = arith.addf %54, %0 : vector<4x512xf32>
    %cst_55 = arith.constant 0.000000e+00 : f32
    %56 = vector.broadcast %cst_55 : f32 to vector<4x512xf32>
    %57 = arith.maximumf %55, %56 : vector<4x512xf32>
    %c0_56 = arith.constant 0 : index
    %c0_57 = arith.constant 0 : index
    %58 = vector.load %arg7[%c0_56, %c0_57] : memref<4x512xf32, #tpu.memory_space<vmem>>, vector<4x512xf32>
    tpu.vector_store %arg7[%c0_56, %c0_57], %57 {strides = array<i32>} : memref<4x512xf32, #tpu.memory_space<vmem>>, vector<4x512xf32>,
    return
  }
  func.func @transform_0(%arg0: i32) -> (i32, i32) {
    %c0_i32 = arith.constant 0 : i32
    %c0_i32_0 = arith.constant 0 : i32
    %c0_i32_1 = arith.constant 0 : i32
    return %c0_i32, %c0_i32_0 : i32, i32
  }
  func.func @transform_1(%arg0: i32) -> (i32, i32) {
    %c0_i32 = arith.constant 0 : i32
    %c0_i32_0 = arith.constant 0 : i32
    %c0_i32_1 = arith.constant 0 : i32
    return %c0_i32, %c0_i32_0 : i32, i32
  }
  func.func @transform_2(%arg0: i32) -> (i32, i32) {
    %c0_i32 = arith.constant 0 : i32
    %c0_i32_0 = arith.constant 0 : i32
    %c0_i32_1 = arith.constant 0 : i32
    return %c0_i32, %c0_i32_0 : i32, i32
  }
  func.func @transform_3(%arg0: i32) -> (i32, i32) {
    %c0_i32 = arith.constant 0 : i32
    %c0_i32_0 = arith.constant 0 : i32
    %c0_i32_1 = arith.constant 0 : i32
    return %c0_i32, %c0_i32_0 : i32, i32
  }
  func.func @transform_4(%arg0: i32) -> (i32, i32) {
    %c0_i32 = arith.constant 0 : i32
    %c0_i32_0 = arith.constant 0 : i32
    %c0_i32_1 = arith.constant 0 : i32
    return %c0_i32, %c0_i32_0 : i32, i32
  }
  func.func @transform_5(%arg0: i32) -> (i32, i32) {
    %c0_i32 = arith.constant 0 : i32
    %c0_i32_0 = arith.constant 0 : i32
    %c0_i32_1 = arith.constant 0 : i32
    return %c0_i32, %c0_i32_0 : i32, i32
  }
  func.func @transform_6(%arg0: i32) -> (i32, i32) {
    %c0_i32 = arith.constant 0 : i32
    %c0_i32_0 = arith.constant 0 : i32
    %c0_i32_1 = arith.constant 0 : i32
    return %c0_i32, %c0_i32_0 : i32, i32
  }
}

</mosaic_0001>

<bundles_post_ra>
// kernel: basic_block_forward.1
= control target key start
LH: loop header
LB: loop body
LE: loop exit
PB: predicated region body
PF: predicated region fallthrough
CT: control target
= control target key end

     0   :  { %s802_s25 = smov 16   ;;  %s804_s26 = smov 17   ;;  %v810_v4 = vmov 0   ;;  %v40_v6 = vlaneseq  ;;  %vm305_vm8 = vcmask 1041408   ;;  %vm301_vm9 = vcmask 293888   ;;  %s1277_s0 = inlined_call_operand.vmem [shape: f32[4,512], index: 0, kind: input, shape index: {}]   ;;  %s1278_s2 = inlined_call_operand.vmem [shape: f32[4,1], index: 2, kind: input, shape index: {}]   ;;  %s1279_s5 = inlined_call_operand.vmem [shape: f32[36,512], index: 5, kind: input, shape index: {}]   ;;  %s1280_s1 = inlined_call_operand.vmem [shape: bf16[4,36], index: 1, kind: input, shape index: {}]   ;;  %s1281_s4 = inlined_call_operand.vmem [shape: f32[4,1], index: 4, kind: input, shape index: {}]   ;;  %s1282_s3 = inlined_call_operand.vmem [shape: bf16[4,36], index: 3, kind: input, shape index: {}]   ;;  %s1283_s6 = inlined_call_operand.vmem [shape: f32[4,512], index: 6, kind: output, shape index: {}]  }
   0x1   :  { %v849_v0 = vld [vmem:[%s1277_s0 + $0x8] sm:$0xff]  ;;  %v854_v1 = vld [vmem:[%s1277_s0] sm:$0xff]  ;;  %s803_s0 = smov 1   ;;  %s805_s27 = smov 15   ;;  %350 = vmatprep.mubr.bf16.mxu0 %v810_v4  ;;  %391 = vmatprep.mubr.bf16.mxu1 %v810_v4  ;;  %v999_v60 = vld [vmem:[%s1279_s5 + $0x18] sm:$0xff] }
   0x2   :  { %55 = vrot.lane.b32.xlu1 %v849_v0, %s802_s25  ;;  %128 = vst [vmem:[#allocation2 + $0x50] sm:$0xf] %v849_v0  ;;  %51 = vrot.lane.b32.xlu0 %v854_v1, %s802_s25  ;;  %126 = vst [vmem:[#allocation2 + $0x40] sm:$0xf] %v854_v1  ;;  %v864_v2 = vcombine.high %v849_v0, %v849_v0  ;;  %v868_v3 = vcombine.high %v854_v1, %v854_v1  ;;  %s806_s28 = smov 127   ;;  %s807_s29 = smov 112  }
   0x3   :  { %s808_s30 = smov 113   ;;  %s809_s7 = smov 111   ;;  %799 = vset.pattern.permute.xlu0 %v810_v4  ;;  %v295_v5 = vld [vmem:[%s1278_s2] sm:$0xf]  ;;  %v938_v7 = vand.u32 127, %v40_v6  ;;  %v980_v49 = vld [vmem:[%s1279_s5 + $0x8] sm:$0xff] }
   0x4   :  { %129 = vst [vmem:[#allocation2 + $0x58] sm:$0xf] %v864_v2  ;;  %127 = vst [vmem:[#allocation2 + $0x48] sm:$0xf] %v868_v3  ;;  %v985_v50 = vld [vmem:[%s1279_s5 + $0x28] sm:$0xff]  ;;  %v994_v59 = vld [vmem:[%s1279_s5] sm:$0xff] }
   0x5   :  { %vm59_vm0 = vcmp.lt.s32.totalorder %v938_v7, 16  ;;  %vm105_vm1 = vcmp.lt.s32.totalorder %v938_v7, 1  ;;  %vm42_vm2 = vcmp.lt.s32.totalorder %v938_v7, 17  ;;  %vm88_vm3 = vcmp.lt.s32.totalorder %v938_v7, 15  ;;  %v1004_v61 = vld [vmem:[%s1279_s5 + $0x20] sm:$0xff]  ;;  %v1009_v62 = vld [vmem:[%s1279_s5 + $0x38] sm:$0xff] }
   0x6   :  { %57 = vrot.lane.b32.xlu1 %v864_v2, %s802_s25  ;;  %53 = vrot.lane.b32.xlu0 %v868_v3, %s802_s25  ;;  %vm138_vm4 = vcmp.lt.s32.totalorder %v938_v7, 127  ;;  %v1014_v63 = vld [vmem:[%s1279_s5 + $0x10] sm:$0xff]  ;;  %vm184_vm5 = vcmp.lt.s32.totalorder %v938_v7, 112  ;;  %vm167_vm6 = vcmp.lt.s32.totalorder %v938_v7, 113  ;;  %vm213_vm7 = vcmp.lt.s32.totalorder %v938_v7, 111 }
   0x7   :  { %v620_v7 = vld [vmem:[%s1279_s5 + $0x80] sm:$0xf] }
   0xa   :  { %99 = vrot.lane.b32.xlu1 %v868_v3, %s803_s0  ;;  %97 = vrot.lane.b32.xlu0 %v854_v1, %s803_s0 }
   0xe   :  { %103 = vrot.lane.b32.xlu1 %v864_v2, %s803_s0  ;;  %101 = vrot.lane.b32.xlu0 %v849_v0, %s803_s0 }
  0x12   :  { %34 = vrot.lane.b32.xlu1 %v868_v3, %s804_s26  ;;  %32 = vrot.lane.b32.xlu0 %v854_v1, %s804_s26 }
  0x16   :  { %38 = vrot.lane.b32.xlu1 %v864_v2, %s804_s26  ;;  %36 = vrot.lane.b32.xlu0 %v849_v0, %s804_s26 }
  0x1a   :  { %82 = vrot.lane.b32.xlu1 %v868_v3, %s805_s27  ;;  %80 = vrot.lane.b32.xlu0 %v854_v1, %s805_s27 }
  0x1e   :  { %86 = vrot.lane.b32.xlu1 %v864_v2, %s805_s27  ;;  %84 = vrot.lane.b32.xlu0 %v849_v0, %s805_s27 }
  0x22   :  { %132 = vrot.lane.b32.xlu1 %v868_v3, %s806_s28  ;;  %130 = vrot.lane.b32.xlu0 %v854_v1, %s806_s28 }
  0x26   :  { %136 = vrot.lane.b32.xlu1 %v864_v2, %s806_s28  ;;  %134 = vrot.lane.b32.xlu0 %v849_v0, %s806_s28 }
  0x2a   :  { %178 = vrot.lane.b32.xlu1 %v868_v3, %s807_s29  ;;  %176 = vrot.lane.b32.xlu0 %v854_v1, %s807_s29 }
  0x2e   :  { %182 = vrot.lane.b32.xlu1 %v864_v2, %s807_s29  ;;  %180 = vrot.lane.b32.xlu0 %v849_v0, %s807_s29 }
  0x32   :  { %161 = vrot.lane.b32.xlu1 %v868_v3, %s808_s30  ;;  %159 = vrot.lane.b32.xlu0 %v854_v1, %s808_s30 }
  0x36   :  { %165 = vrot.lane.b32.xlu1 %v864_v2, %s808_s30  ;;  %163 = vrot.lane.b32.xlu0 %v849_v0, %s808_s30 }
  0x3a   :  { %207 = vrot.lane.b32.xlu1 %v868_v3, %s809_s7  ;;  %205 = vrot.lane.b32.xlu0 %v854_v1, %s809_s7 }
  0x3e   :  { %211 = vrot.lane.b32.xlu1 %v864_v2, %s809_s7  ;;  %209 = vrot.lane.b32.xlu0 %v849_v0, %s809_s7 }
  0x42   :  { %298 = vperm.xlu0 %799, %v295_v5  }
  0x74   :  { %v56_v8 = vpop.permute.xlu1 %55  ;;  %v52_v9 = vpop.permute.xlu0 %51 }
  0x78   :  { %v58_v10 = vpop.permute.xlu1 %57  ;;  %v54_v11 = vpop.permute.xlu0 %53 }
  0x79   :  { %v60_v12 = vsel %vm59_vm0, %v56_v8, %v58_v10  ;;  %v63_v13 = vsel %vm59_vm0, %v58_v10, %v52_v9  ;;  %v61_v14 = vsel %vm59_vm0, %v54_v11, %v56_v8  ;;  %v62_v15 = vsel %vm59_vm0, %v52_v9, %v54_v11  ;;  %v1020_v11 = vld [vmem:[%s1279_s5 + $0x30] sm:$0xff] }
  0x7a   :  { %v68_v16 = vrot.slane %v63_v13, 4  ;;  %v71_v17 = vrot.slane %v60_v12, 4  ;;  %v69_v18 = vrot.slane %v62_v15, 4  ;;  %v70_v19 = vrot.slane %v61_v14, 4 }
  0x7c   :  { %76 = vst [vmem:[#allocation2] sm:$0xf0] %v68_v16  ;;  %79 = vst [vmem:[#allocation2 + $0x18] sm:$0xf0] %v71_v17  ;;  %v100_v20 = vpop.permute.xlu1 %99  ;;  %v98_v21 = vpop.permute.xlu0 %97 }
  0x7d   :  { %77 = vst [vmem:[#allocation2 + $0x8] sm:$0xf0] %v69_v18  ;;  %78 = vst [vmem:[#allocation2 + $0x10] sm:$0xf0] %v70_v19  ;;  %v108_v22 = vsel %vm105_vm1, %v98_v21, %v100_v20 }
  0x7e   :  { %v115_v23 = vrot.slane %v108_v22, 4 }
  0x80   :  { %123 = vst [vmem:[#allocation2 + $0x28] sm:$0xf0] %v115_v23  ;;  %v104_v24 = vpop.permute.xlu1 %103  ;;  %v102_v25 = vpop.permute.xlu0 %101 }
  0x81   :  { %v109_v26 = vsel %vm105_vm1, %v104_v24, %v98_v21  ;;  %v106_v27 = vsel %vm105_vm1, %v102_v25, %v104_v24  ;;  %v107_v28 = vsel %vm105_vm1, %v100_v20, %v102_v25 }
  0x82   :  { %v114_v29 = vrot.slane %v109_v26, 4  ;;  %v116_v30 = vrot.slane %v107_v28, 4  ;;  %v117_v31 = vrot.slane %v106_v27, 4 }
  0x84   :  { %122 = vst [vmem:[#allocation2 + $0x20] sm:$0xf0] %v114_v29  ;;  %124 = vst [vmem:[#allocation2 + $0x30] sm:$0xf0] %v116_v30  ;;  %v35_v32 = vpop.permute.xlu1 %34  ;;  %v33_v33 = vpop.permute.xlu0 %32 }
  0x85   :  { %125 = vst [vmem:[#allocation2 + $0x38] sm:$0xf0] %v117_v31  ;;  %v45_v34 = vsel %vm42_vm2, %v33_v33, %v35_v32 }
  0x86   :  { %48 = vst [vmem:[#allocation2 + $0x8] sm:$0xf] %v45_v34 }
  0x88   :  { %v39_v35 = vpop.permute.xlu1 %38  ;;  %v37_v36 = vpop.permute.xlu0 %36 }
  0x89   :  { %v46_v37 = vsel %vm42_vm2, %v39_v35, %v33_v33  ;;  %v43_v38 = vsel %vm42_vm2, %v37_v36, %v39_v35  ;;  %v44_v39 = vsel %vm42_vm2, %v35_v32, %v37_v36 }
  0x8a   :  { %47 = vst [vmem:[#allocation2] sm:$0xf] %v46_v37  ;;  %49 = vst [vmem:[#allocation2 + $0x10] sm:$0xf] %v44_v39 }
  0x8b   :  { %50 = vst [vmem:[#allocation2 + $0x18] sm:$0xf] %v43_v38 }
  0x8c   :  { %v83_v40 = vpop.permute.xlu1 %82  ;;  %v81_v41 = vpop.permute.xlu0 %80 }
  0x8d   :  { %v91_v42 = vsel %vm88_vm3, %v81_v41, %v83_v40  ;;  %v223_v48 = vld [vmem:[#allocation2 + $0x8] sm:$0xff] }
  0x8e   :  { %94 = vst [vmem:[#allocation2 + $0x28] sm:$0xf] %v91_v42  ;;  %v263_v56 = vmul.f32 %v980_v49, %v223_v48 }
  0x90   :  { %v87_v43 = vpop.permute.xlu1 %86  ;;  %v85_v44 = vpop.permute.xlu0 %84 }
  0x91   :  { %v92_v45 = vsel %vm88_vm3, %v87_v43, %v81_v41  ;;  %v89_v46 = vsel %vm88_vm3, %v85_v44, %v87_v43  ;;  %v90_v47 = vsel %vm88_vm3, %v83_v40, %v85_v44  ;;  %v222_v58 = vld [vmem:[#allocation2] sm:$0xff]  ;;  %v224_v10 = vld [vmem:[#allocation2 + $0x10] sm:$0xff] }
  0x92   :  { %93 = vst [vmem:[#allocation2 + $0x20] sm:$0xf] %v92_v45  ;;  %95 = vst [vmem:[#allocation2 + $0x30] sm:$0xf] %v90_v47  ;;  %v225_v9 = vld [vmem:[#allocation2 + $0x18] sm:$0xff]  ;;  %v262_v16 = vmul.f32 %v994_v59, %v222_v58  ;;  %v264_v25 = vmul.f32 %v1014_v63, %v224_v10 }
  0x93   :  { %96 = vst [vmem:[#allocation2 + $0x38] sm:$0xf] %v89_v46  ;;  %v265_v23 = vmul.f32 %v999_v60, %v225_v9  ;;  %v1077_v9 = vld [vmem:[%s1279_s5 + $0x60] sm:$0xff]  ;;  %v1082_v10 = vld [vmem:[%s1279_s5 + $0x78] sm:$0xff] }
  0x94   :  { %v133_v51 = vpop.permute.xlu1 %132  ;;  %v131_v52 = vpop.permute.xlu0 %130 }
  0x95   :  { %v141_v53 = vsel %vm138_vm4, %v131_v52, %v133_v51  ;;  %v227_v54 = vld [vmem:[#allocation2 + $0x28] sm:$0xff] }
  0x96   :  { %v147_v55 = vrot.slane %v141_v53, 4  ;;  %v267_v57 = vmul.f32 %v985_v50, %v227_v54  ;;  %v1055_v54 = vld [vmem:[%s1279_s5 + $0x48] sm:$0xff] }
  0x98   :  { %155 = vst [vmem:[#allocation2 + $0x40] sm:$0xf0] %v147_v55  ;;  %v137_v5 = vpop.permute.xlu1 %136  ;;  %v135_v6 = vpop.permute.xlu0 %134  ;;  %v283_v8 = vpack.c.bf16 %v267_v57, %v263_v56  ;;  %v1060_v55 = vld [vmem:[%s1279_s5 + $0x58] sm:$0xff] }
  0x99   :  { %v142_v12 = vsel %vm138_vm4, %v137_v5, %v131_v52  ;;  %v139_v13 = vsel %vm138_vm4, %v135_v6, %v137_v5  ;;  %v140_v14 = vsel %vm138_vm4, %v133_v51, %v135_v6  ;;  %v226_v15 = vld [vmem:[#allocation2 + $0x20] sm:$0xff]  ;;  %v228_v18 = vld [vmem:[#allocation2 + $0x30] sm:$0xff]  ;;  %v1072_v6 = vld [vmem:[%s1279_s5 + $0x68] sm:$0xff] }
  0x9a   :  { %v229_v17 = vld [vmem:[#allocation2 + $0x38] sm:$0xff]  ;;  %v150_v19 = vrot.slane %v142_v12, 4  ;;  %v148_v20 = vrot.slane %v140_v14, 4  ;;  %v149_v21 = vrot.slane %v139_v13, 4  ;;  %318 = vmatprep.subr.bf16.mxu0 %v283_v8  ;;  %v266_v22 = vmul.f32 %v1004_v61, %v226_v15  ;;  %v1067_v5 = vld [vmem:[%s1279_s5 + $0x50] sm:$0xff] }
  0x9b   :  { %v269_v24 = vmul.f32 %v1009_v62, %v229_v17  ;;  %v268_v26 = vmul.f32 %v1020_v11, %v228_v18  ;;  %v1087_v13 = vld [vmem:[%s1279_s5 + $0x70] sm:$0xff] }
  0x9c   :  { %158 = vst [vmem:[#allocation2 + $0x58] sm:$0xf0] %v150_v19  ;;  %156 = vst [vmem:[#allocation2 + $0x48] sm:$0xf0] %v148_v20  ;;  %v179_v27 = vpop.permute.xlu1 %178  ;;  %v177_v28 = vpop.permute.xlu0 %176  ;;  %v282_v29 = vpack.c.bf16 %v266_v22, %v262_v16  ;;  %v1094_v19 = vld [vmem:[%s1279_s5 + $0x40] sm:$0xff] }
  0x9d   :  { %157 = vst [vmem:[#allocation2 + $0x50] sm:$0xf0] %v149_v21  ;;  %v187_v30 = vsel %vm184_vm5, %v177_v28, %v179_v27  ;;  %v285_v31 = vpack.c.bf16 %v269_v24, %v265_v23  ;;  %v284_v32 = vpack.c.bf16 %v268_v26, %v264_v25 }
  0x9e   :  { %v193_v33 = vrot.slane %v187_v30, 4  ;;  %319 = vmatpush1.bf16.msra.mxu0 %v282_v29 }
  0x9f   :  { %359 = vmatprep.subr.bf16.mxu1 %v285_v31  ;;  %v230_v18 = vld [vmem:[#allocation2 + $0x40] sm:$0xff] }
  0xa0   :  { %201 = vst [vmem:[#allocation2 + $0x60] sm:$0xf0] %v193_v33  ;;  %360 = vmatpush1.bf16.msra.mxu1 %v284_v32  ;;  %v183_v34 = vpop.permute.xlu1 %182  ;;  %v181_v35 = vpop.permute.xlu0 %180  ;;  %v270_v31 = vmul.f32 %v1094_v19, %v230_v18  ;;  %v258_v32 = vld [vmem:[%s1279_s5 + $0x80] sm:$0xf] }
  0xa1   :  { %v188_v36 = vsel %vm184_vm5, %v183_v34, %v177_v28  ;;  %v185_v37 = vsel %vm184_vm5, %v181_v35, %v183_v34  ;;  %v186_v38 = vsel %vm184_vm5, %v179_v27, %v181_v35 }
  0xa2   :  { %v196_v39 = vrot.slane %v188_v36, 4  ;;  %v194_v40 = vrot.slane %v186_v38, 4  ;;  %v195_v41 = vrot.slane %v185_v37, 4 }
  0xa3   :  { %v231_v57 = vld [vmem:[#allocation2 + $0x48] sm:$0xff]  ;;  %v233_v58 = vld [vmem:[#allocation2 + $0x58] sm:$0xff] }
  0xa4   :  { %204 = vst [vmem:[#allocation2 + $0x78] sm:$0xf0] %v196_v39  ;;  %202 = vst [vmem:[#allocation2 + $0x68] sm:$0xf0] %v194_v40  ;;  %v162_v42 = vpop.permute.xlu1 %161  ;;  %v160_v43 = vpop.permute.xlu0 %159  ;;  %v232_v12 = vld [vmem:[#allocation2 + $0x50] sm:$0xff]  ;;  %v271_v16 = vmul.f32 %v1055_v54, %v231_v57  ;;  %v273_v17 = vmul.f32 %v1060_v55, %v233_v58 }
  0xa5   :  { %203 = vst [vmem:[#allocation2 + $0x70] sm:$0xf0] %v195_v41  ;;  %v170_v44 = vsel %vm167_vm6, %v160_v43, %v162_v42  ;;  %v272_v29 = vmul.f32 %v1067_v5, %v232_v12  ;;  %v259_v39 = vld [vmem:[%s1279_s5 + $0x88] sm:$0xf]  ;;  %v261_v40 = vld [vmem:[%s1279_s5 + $0x98] sm:$0xf] }
  0xa6   :  { %172 = vst [vmem:[#allocation2 + $0x60] sm:$0xf] %v170_v44  ;;  %v260_v41 = vld [vmem:[%s1279_s5 + $0x90] sm:$0xf]  ;;  %v294_v58 = vld [vmem:[%s1280_s1] sm:$0x3] }
  0xa8   :  { %v166_v45 = vpop.permute.xlu1 %165  ;;  %v164_v46 = vpop.permute.xlu0 %163 }
  0xa9   :  { %v171_v47 = vsel %vm167_vm6, %v166_v45, %v160_v43  ;;  %v168_v48 = vsel %vm167_vm6, %v164_v46, %v166_v45  ;;  %v169_v51 = vsel %vm167_vm6, %v162_v42, %v164_v46 }
  0xaa   :  { %175 = vst [vmem:[#allocation2 + $0x78] sm:$0xf] %v171_v47  ;;  %173 = vst [vmem:[#allocation2 + $0x68] sm:$0xf] %v169_v51 }
  0xab   :  { %174 = vst [vmem:[#allocation2 + $0x70] sm:$0xf] %v168_v48 }
  0xac   :  { %v208_v52 = vpop.permute.xlu1 %207  ;;  %v206_v53 = vpop.permute.xlu0 %205 }
  0xad   :  { %v216_v56 = vsel %vm213_vm7, %v206_v53, %v208_v52  ;;  %v234_v8 = vld [vmem:[#allocation2 + $0x60] sm:$0xff] }
  0xae   :  { %218 = vst [vmem:[#allocation2 + $0x80] sm:$0xf] %v216_v56  ;;  %v274_v25 = vmul.f32 %v1077_v9, %v234_v8 }
  0xb0   :  { %v212_v14 = vpop.permute.xlu1 %211  ;;  %v210_v15 = vpop.permute.xlu0 %209  ;;  %v286_v36 = vpack.c.bf16 %v274_v25, %v270_v31 }
  0xb1   :  { %v217_v20 = vsel %vm213_vm7, %v212_v14, %v206_v53  ;;  %v214_v21 = vsel %vm213_vm7, %v210_v15, %v212_v14  ;;  %v215_v22 = vsel %vm213_vm7, %v208_v52, %v210_v15  ;;  %v235_v23 = vld [vmem:[#allocation2 + $0x68] sm:$0xff]  ;;  %v237_v24 = vld [vmem:[#allocation2 + $0x78] sm:$0xff] }
  0xb2   :  { %v236_v26 = vld [vmem:[#allocation2 + $0x70] sm:$0xff]  ;;  %221 = vst [vmem:[#allocation2 + $0x98] sm:$0xf] %v217_v20  ;;  %219 = vst [vmem:[#allocation2 + $0x88] sm:$0xf] %v215_v22  ;;  %v275_v27 = vmul.f32 %v1072_v6, %v235_v23  ;;  %v277_v28 = vmul.f32 %v1082_v10, %v237_v24 }
  0xb3   :  { %220 = vst [vmem:[#allocation2 + $0x90] sm:$0xf] %v214_v21  ;;  %v276_v30 = vmul.f32 %v1087_v13, %v236_v26 }
  0xb4   :  { %v287_v33 = vpack.c.bf16 %v275_v27, %v271_v16  ;;  %v289_v34 = vpack.c.bf16 %v277_v28, %v273_v17 }
  0xb5   :  { %v288_v35 = vpack.c.bf16 %v276_v30, %v272_v29  ;;  %v238_v37 = vld [vmem:[#allocation2 + $0x80] sm:$0xf] }
  0xb6   :  { %320 = vmatprep.subr.bf16.mxu0 %v287_v33  ;;  %361 = vmatprep.subr.bf16.mxu1 %v289_v34  ;;  %v278_v38 = vmul.f32 %v258_v32, %v238_v37 }
  0xb7   :  { %321 = vmatpush1.bf16.msra.mxu0 %v286_v36  ;;  %362 = vmatpush1.bf16.msra.mxu1 %v288_v35 }
  0xb8   :  { %v290_v47 = vpack.c.bf16 %v278_v38, %v278_v38 }
  0xb9   :  { %v239_v42 = vld [vmem:[#allocation2 + $0x88] sm:$0xf]  ;;  %v241_v43 = vld [vmem:[#allocation2 + $0x98] sm:$0xf] }
  0xba   :  { %v240_v44 = vld [vmem:[#allocation2 + $0x90] sm:$0xf]  ;;  %v279_v45 = vmul.f32 %v259_v39, %v239_v42  ;;  %v281_v46 = vmul.f32 %v261_v40, %v241_v43  ;;  %v307_v56 = vsel %vm305_vm8, %v290_v47, 0 }
  0xbb   :  { %v280_v48 = vmul.f32 %v260_v41, %v240_v44 }
  0xbc   :  { %v291_v51 = vpack.c.bf16 %v279_v45, %v279_v45  ;;  %v293_v52 = vpack.c.bf16 %v281_v46, %v281_v46 }
  0xbd   :  { %v292_v53 = vpack.c.bf16 %v280_v48, %v280_v48 }
  0xbe   :  { %782 = vmatprep.subr.msk.bf16.mxu0 %vm305_vm8, %v291_v51  ;;  %784 = vmatprep.subr.msk.bf16.mxu1 %vm305_vm8, %v293_v52 }
  0xbf   :  { %v313_v57 = vsel %vm305_vm8, %v292_v53, 0  ;;  %323 = vmatpush1.bf16.msra.mxu0 %v307_v56 }
  0xc0   :  { %364 = vmatpush1.bf16.msra.mxu1 %v313_v57 }
  0xc1   :  { %v299_v8 = vpop.permute.xlu0 %298 }
  0xc2   :  { %783 = vmatmul.mubr.msk.bf16.vlgmr.msra.gmra.mrb[0].mxu0 %vm301_vm9, %v294_v58 }
  0xc3   :  { %785 = vmatmul.mubr.msk.bf16.vlgmr.msra.gmra.mrb[0].mxu1 %vm301_vm9, %v294_v58  ;;  %710 = vmatprep.mubr.bf16.mxu0 %v810_v4 }
  0xc4   :  { %751 = vmatprep.mubr.bf16.mxu1 %v810_v4  ;;  %v657_v4 = vld [vmem:[%s1281_s4] sm:$0xf] }
 0x195   :  { %v352_v14 = vpop.f32.mrb[0].mxu0 }
 0x196   :  { %v393_v12 = vpop.f32.mrb[0].mxu1  ;;  %v353_v16 = vadd.f32 %v352_v14, %v299_v8  ;;  %v354_v17 = vpop.f32.mrb[1].mxu0 }
 0x197   :  { %v394_v15 = vadd.f32 %v393_v12, %v299_v8  ;;  %v395_v18 = vpop.f32.mrb[1].mxu1  ;;  %v355_v20 = vadd.f32 %v354_v17, %v299_v8  ;;  %v356_v22 = vpop.f32.mrb[2].mxu0 }
 0x198   :  { %v396_v21 = vadd.f32 %v395_v18, %v299_v8  ;;  %v397_v23 = vpop.f32.mrb[2].mxu1  ;;  %v400_v25 = vmax.f32 %v353_v16, 0.0  ;;  %v357_v26 = vpop.f32.mrb[3].mxu0 }
 0x199   :  { %v402_v24 = vmax.f32 %v394_v15, 0.0  ;;  %v398_v27 = vpop.f32.mrb[3].mxu1  ;;  %v401_v28 = vmax.f32 %v355_v20, 0.0 }
 0x19a   :  { %v403_v29 = vmax.f32 %v396_v21, 0.0  ;;  %492 = vst [vmem:[#allocation2 + $0x40] sm:$0xf] %v400_v25  ;;  %420 = vrot.lane.b32.xlu1 %v400_v25, %s802_s25 }
 0x19b   :  { %494 = vst [vmem:[#allocation2 + $0x50] sm:$0xf] %v402_v24  ;;  %424 = vrot.lane.b32.xlu0 %v402_v24, %s802_s25  ;;  %493 = vst [vmem:[#allocation2 + $0x48] sm:$0xf] %v401_v28 }
 0x19c   :  { %495 = vst [vmem:[#allocation2 + $0x58] sm:$0xf] %v403_v29 }
 0x19e   :  { %422 = vrot.lane.b32.xlu1 %v401_v28, %s802_s25 }
 0x19f   :  { %464 = vrot.lane.b32.xlu0 %v400_v25, %s803_s0 }
 0x1a2   :  { %426 = vrot.lane.b32.xlu1 %v403_v29, %s802_s25 }
 0x1a3   :  { %468 = vrot.lane.b32.xlu0 %v402_v24, %s803_s0 }
 0x1a6   :  { %466 = vrot.lane.b32.xlu1 %v401_v28, %s803_s0 }
 0x1a7   :  { %404 = vrot.lane.b32.xlu0 %v400_v25, %s804_s26 }
 0x1aa   :  { %470 = vrot.lane.b32.xlu1 %v403_v29, %s803_s0 }
 0x1ab   :  { %408 = vrot.lane.b32.xlu0 %v402_v24, %s804_s26 }
 0x1ae   :  { %406 = vrot.lane.b32.xlu1 %v401_v28, %s804_s26 }
 0x1af   :  { %448 = vrot.lane.b32.xlu0 %v400_v25, %s805_s27 }
 0x1b2   :  { %410 = vrot.lane.b32.xlu1 %v403_v29, %s804_s26 }
 0x1b3   :  { %452 = vrot.lane.b32.xlu0 %v402_v24, %s805_s27 }
 0x1b6   :  { %450 = vrot.lane.b32.xlu1 %v401_v28, %s805_s27 }
 0x1b7   :  { %496 = vrot.lane.b32.xlu0 %v400_v25, %s806_s28 }
 0x1ba   :  { %454 = vrot.lane.b32.xlu1 %v403_v29, %s805_s27 }
 0x1bb   :  { %500 = vrot.lane.b32.xlu0 %v402_v24, %s806_s28 }
 0x1be   :  { %498 = vrot.lane.b32.xlu1 %v401_v28, %s806_s28 }
 0x1bf   :  { %540 = vrot.lane.b32.xlu0 %v400_v25, %s807_s29 }
 0x1c2   :  { %502 = vrot.lane.b32.xlu1 %v403_v29, %s806_s28 }
 0x1c3   :  { %544 = vrot.lane.b32.xlu0 %v402_v24, %s807_s29 }
 0x1c6   :  { %542 = vrot.lane.b32.xlu1 %v401_v28, %s807_s29 }
 0x1c7   :  { %524 = vrot.lane.b32.xlu0 %v400_v25, %s808_s30 }
 0x1ca   :  { %546 = vrot.lane.b32.xlu1 %v403_v29, %s807_s29 }
 0x1cb   :  { %528 = vrot.lane.b32.xlu0 %v402_v24, %s808_s30 }
 0x1ce   :  { %526 = vrot.lane.b32.xlu1 %v401_v28, %s808_s30 }
 0x1cf   :  { %568 = vrot.lane.b32.xlu0 %v400_v25, %s809_s7 }
 0x1d2   :  { %530 = vrot.lane.b32.xlu1 %v403_v29, %s808_s30 }
 0x1d3   :  { %572 = vrot.lane.b32.xlu0 %v402_v24, %s809_s7 }
 0x1d6   :  { %570 = vrot.lane.b32.xlu1 %v401_v28, %s809_s7 }
 0x1d7   :  { %660 = vperm.xlu0 %799, %v657_v4  }
 0x1da   :  { %574 = vrot.lane.b32.xlu1 %v403_v29, %s809_s7 }
 0x20c   :  { %v421_v31 = vpop.permute.xlu1 %420 }
 0x20d   :  { %v425_v30 = vpop.permute.xlu0 %424 }
 0x210   :  { %v423_v33 = vpop.permute.xlu1 %422 }
 0x211   :  { %v465_v32 = vpop.permute.xlu0 %464  ;;  %v429_v34 = vsel %vm59_vm0, %v423_v33, %v425_v30  ;;  %v430_v35 = vsel %vm59_vm0, %v421_v31, %v423_v33 }
 0x212   :  { %v437_v36 = vrot.slane %v430_v35, 4  ;;  %v438_v37 = vrot.slane %v429_v34, 4 }
 0x214   :  { %445 = vst [vmem:[#allocation2 + $0x8] sm:$0xf0] %v437_v36  ;;  %446 = vst [vmem:[#allocation2 + $0x10] sm:$0xf0] %v438_v37  ;;  %v427_v39 = vpop.permute.xlu1 %426 }
 0x215   :  { %v469_v38 = vpop.permute.xlu0 %468  ;;  %v428_v40 = vsel %vm59_vm0, %v425_v30, %v427_v39  ;;  %v431_v41 = vsel %vm59_vm0, %v427_v39, %v421_v31 }
 0x216   :  { %v436_v42 = vrot.slane %v431_v41, 4  ;;  %v439_v43 = vrot.slane %v428_v40, 4 }
 0x218   :  { %444 = vst [vmem:[#allocation2] sm:$0xf0] %v436_v42  ;;  %447 = vst [vmem:[#allocation2 + $0x18] sm:$0xf0] %v439_v43  ;;  %v467_v45 = vpop.permute.xlu1 %466 }
 0x219   :  { %v405_v44 = vpop.permute.xlu0 %404  ;;  %v473_v46 = vsel %vm105_vm1, %v467_v45, %v469_v38  ;;  %v474_v47 = vsel %vm105_vm1, %v465_v32, %v467_v45 }
 0x21a   :  { %v481_v48 = vrot.slane %v474_v47, 4  ;;  %v482_v51 = vrot.slane %v473_v46, 4 }
 0x21c   :  { %489 = vst [vmem:[#allocation2 + $0x28] sm:$0xf0] %v481_v48  ;;  %490 = vst [vmem:[#allocation2 + $0x30] sm:$0xf0] %v482_v51  ;;  %v471_v53 = vpop.permute.xlu1 %470 }
 0x21d   :  { %v409_v52 = vpop.permute.xlu0 %408  ;;  %v472_v56 = vsel %vm105_vm1, %v469_v38, %v471_v53  ;;  %v475_v57 = vsel %vm105_vm1, %v471_v53, %v465_v32 }
 0x21e   :  { %v480_v58 = vrot.slane %v475_v57, 4  ;;  %v483_v8 = vrot.slane %v472_v56, 4 }
 0x220   :  { %488 = vst [vmem:[#allocation2 + $0x20] sm:$0xf0] %v480_v58  ;;  %491 = vst [vmem:[#allocation2 + $0x38] sm:$0xf0] %v483_v8  ;;  %v407_v14 = vpop.permute.xlu1 %406 }
 0x221   :  { %v449_v12 = vpop.permute.xlu0 %448  ;;  %v413_v15 = vsel %vm42_vm2, %v407_v14, %v409_v52  ;;  %v414_v16 = vsel %vm42_vm2, %v405_v44, %v407_v14 }
 0x222   :  { %417 = vst [vmem:[#allocation2 + $0x8] sm:$0xf] %v414_v16  ;;  %418 = vst [vmem:[#allocation2 + $0x10] sm:$0xf] %v413_v15 }
 0x224   :  { %v411_v18 = vpop.permute.xlu1 %410 }
 0x225   :  { %v453_v17 = vpop.permute.xlu0 %452  ;;  %v412_v20 = vsel %vm42_vm2, %v409_v52, %v411_v18  ;;  %v415_v21 = vsel %vm42_vm2, %v411_v18, %v405_v44 }
 0x226   :  { %416 = vst [vmem:[#allocation2] sm:$0xf] %v415_v21  ;;  %419 = vst [vmem:[#allocation2 + $0x18] sm:$0xf] %v412_v20 }
 0x228   :  { %v451_v23 = vpop.permute.xlu1 %450 }
 0x229   :  { %v497_v22 = vpop.permute.xlu0 %496  ;;  %v457_v24 = vsel %vm88_vm3, %v451_v23, %v453_v17  ;;  %v458_v25 = vsel %vm88_vm3, %v449_v12, %v451_v23  ;;  %v585_v4 = vld [vmem:[#allocation2 + $0x8] sm:$0xff]  ;;  %v586_v46 = vld [vmem:[#allocation2 + $0x10] sm:$0xff] }
 0x22a   :  { %461 = vst [vmem:[#allocation2 + $0x28] sm:$0xf] %v458_v25  ;;  %462 = vst [vmem:[#allocation2 + $0x30] sm:$0xf] %v457_v24  ;;  %v625_v38 = vmul.f32 %v585_v4, %v980_v49  ;;  %v626_v58 = vmul.f32 %v586_v46, %v1014_v63 }
 0x22c   :  { %v455_v27 = vpop.permute.xlu1 %454 }
 0x22d   :  { %v501_v26 = vpop.permute.xlu0 %500  ;;  %v456_v28 = vsel %vm88_vm3, %v453_v17, %v455_v27  ;;  %v459_v29 = vsel %vm88_vm3, %v455_v27, %v449_v12  ;;  %v584_v35 = vld [vmem:[#allocation2] sm:$0xff]  ;;  %v587_v40 = vld [vmem:[#allocation2 + $0x18] sm:$0xff] }
 0x22e   :  { %460 = vst [vmem:[#allocation2 + $0x20] sm:$0xf] %v459_v29  ;;  %463 = vst [vmem:[#allocation2 + $0x38] sm:$0xf] %v456_v28  ;;  %v624_v45 = vmul.f32 %v584_v35, %v994_v59 }
 0x230   :  { %v499_v31 = vpop.permute.xlu1 %498 }
 0x231   :  { %v541_v30 = vpop.permute.xlu0 %540  ;;  %v505_v32 = vsel %vm138_vm4, %v499_v31, %v501_v26  ;;  %v506_v33 = vsel %vm138_vm4, %v497_v22, %v499_v31  ;;  %v589_v34 = vld [vmem:[#allocation2 + $0x28] sm:$0xff]  ;;  %v590_v41 = vld [vmem:[#allocation2 + $0x30] sm:$0xff] }
 0x232   :  { %v512_v36 = vrot.slane %v506_v33, 4  ;;  %v513_v37 = vrot.slane %v505_v32, 4  ;;  %v629_v39 = vmul.f32 %v589_v34, %v985_v50  ;;  %v627_v50 = vmul.f32 %v587_v40, %v999_v60 }
 0x233   :  { %v630_v52 = vmul.f32 %v590_v41, %v1020_v11 }
 0x234   :  { %520 = vst [vmem:[#allocation2 + $0x40] sm:$0xf0] %v512_v36  ;;  %521 = vst [vmem:[#allocation2 + $0x48] sm:$0xf0] %v513_v37  ;;  %v503_v43 = vpop.permute.xlu1 %502  ;;  %v645_v44 = vpack.c.bf16 %v629_v39, %v625_v38 }
 0x235   :  { %v545_v42 = vpop.permute.xlu0 %544  ;;  %v504_v47 = vsel %vm138_vm4, %v501_v26, %v503_v43  ;;  %v507_v48 = vsel %vm138_vm4, %v503_v43, %v497_v22  ;;  %v588_v51 = vld [vmem:[#allocation2 + $0x20] sm:$0xff]  ;;  %v591_v49 = vld [vmem:[#allocation2 + $0x38] sm:$0xff]  ;;  %v646_v16 = vpack.c.bf16 %v630_v52, %v626_v58 }
 0x236   :  { %v514_v53 = vrot.slane %v504_v47, 4  ;;  %v515_v56 = vrot.slane %v507_v48, 4  ;;  %678 = vmatprep.subr.bf16.mxu0 %v645_v44  ;;  %v628_v57 = vmul.f32 %v588_v51, %v1004_v61  ;;  %v631_v59 = vmul.f32 %v591_v49, %v1009_v62  ;;  %v621_v49 = vld [vmem:[%s1279_s5 + $0x88] sm:$0xf] }
 0x238   :  { %522 = vst [vmem:[#allocation2 + $0x50] sm:$0xf0] %v514_v53  ;;  %523 = vst [vmem:[#allocation2 + $0x58] sm:$0xf0] %v515_v56  ;;  %v543_v12 = vpop.permute.xlu1 %542  ;;  %v644_v14 = vpack.c.bf16 %v628_v57, %v624_v45  ;;  %v647_v15 = vpack.c.bf16 %v631_v59, %v627_v50 }
 0x239   :  { %v525_v8 = vpop.permute.xlu0 %524  ;;  %v549_v60 = vsel %vm184_vm5, %v543_v12, %v545_v42  ;;  %v550_v11 = vsel %vm184_vm5, %v541_v30, %v543_v12 }
 0x23a   :  { %v556_v17 = vrot.slane %v550_v11, 4  ;;  %v557_v18 = vrot.slane %v549_v60, 4  ;;  %679 = vmatpush1.bf16.msra.mxu0 %v644_v14  ;;  %719 = vmatprep.subr.bf16.mxu1 %v647_v15  ;;  %v656_v60 = vld [vmem:[%s1282_s3] sm:$0x3] }
 0x23b   :  { %720 = vmatpush1.bf16.msra.mxu1 %v646_v16  ;;  %v593_v4 = vld [vmem:[#allocation2 + $0x48] sm:$0xff] }
 0x23c   :  { %564 = vst [vmem:[#allocation2 + $0x60] sm:$0xf0] %v556_v17  ;;  %565 = vst [vmem:[#allocation2 + $0x68] sm:$0xf0] %v557_v18  ;;  %v547_v62 = vpop.permute.xlu1 %546  ;;  %v633_v37 = vmul.f32 %v593_v4, %v1055_v54 }
 0x23d   :  { %v529_v61 = vpop.permute.xlu0 %528  ;;  %v548_v63 = vsel %vm184_vm5, %v545_v42, %v547_v62  ;;  %v551_v20 = vsel %vm184_vm5, %v547_v62, %v541_v30  ;;  %v592_v30 = vld [vmem:[#allocation2 + $0x40] sm:$0xff] }
 0x23e   :  { %v558_v21 = vrot.slane %v548_v63, 4  ;;  %v559_v22 = vrot.slane %v551_v20, 4  ;;  %v632_v39 = vmul.f32 %v592_v30, %v1094_v19 }
 0x23f   :  { %v595_v41 = vld [vmem:[#allocation2 + $0x58] sm:$0xff]  ;;  %v594_v42 = vld [vmem:[#allocation2 + $0x50] sm:$0xff] }
 0x240   :  { %566 = vst [vmem:[#allocation2 + $0x70] sm:$0xf0] %v558_v21  ;;  %567 = vst [vmem:[#allocation2 + $0x78] sm:$0xf0] %v559_v22  ;;  %v527_v23 = vpop.permute.xlu1 %526  ;;  %v635_v54 = vmul.f32 %v595_v41, %v1060_v55 }
 0x241   :  { %v533_v24 = vsel %vm167_vm6, %v527_v23, %v529_v61  ;;  %v534_v25 = vsel %vm167_vm6, %v525_v8, %v527_v23  ;;  %v569_v26 = vpop.permute.xlu0 %568 }
 0x242   :  { %536 = vst [vmem:[#allocation2 + $0x60] sm:$0xf] %v534_v25  ;;  %537 = vst [vmem:[#allocation2 + $0x68] sm:$0xf] %v533_v24 }
 0x244   :  { %v531_v27 = vpop.permute.xlu1 %530 }
 0x245   :  { %v532_v28 = vsel %vm167_vm6, %v529_v61, %v531_v27  ;;  %v535_v29 = vsel %vm167_vm6, %v531_v27, %v525_v8  ;;  %v573_v31 = vpop.permute.xlu0 %572 }
 0x246   :  { %538 = vst [vmem:[#allocation2 + $0x70] sm:$0xf] %v532_v28  ;;  %539 = vst [vmem:[#allocation2 + $0x78] sm:$0xf] %v535_v29 }
 0x248   :  { %v571_v32 = vpop.permute.xlu1 %570 }
 0x249   :  { %v577_v33 = vsel %vm213_vm7, %v571_v32, %v573_v31  ;;  %v578_v34 = vsel %vm213_vm7, %v569_v26, %v571_v32  ;;  %v597_v35 = vld [vmem:[#allocation2 + $0x68] sm:$0xff]  ;;  %v596_v36 = vld [vmem:[#allocation2 + $0x60] sm:$0xff] }
 0x24a   :  { %580 = vst [vmem:[#allocation2 + $0x80] sm:$0xf] %v578_v34  ;;  %581 = vst [vmem:[#allocation2 + $0x88] sm:$0xf] %v577_v33  ;;  %v637_v38 = vmul.f32 %v597_v35, %v1072_v6  ;;  %v636_v40 = vmul.f32 %v596_v36, %v1077_v9  ;;  %v634_v9 = vmul.f32 %v594_v42, %v1067_v5  ;;  %v623_v5 = vld [vmem:[%s1279_s5 + $0x98] sm:$0xf] }
 0x24c   :  { %v575_v43 = vpop.permute.xlu1 %574  ;;  %v649_v44 = vpack.c.bf16 %v637_v38, %v633_v37  ;;  %v648_v45 = vpack.c.bf16 %v636_v40, %v632_v39 }
 0x24d   :  { %v576_v46 = vsel %vm213_vm7, %v573_v31, %v575_v43  ;;  %v579_v47 = vsel %vm213_vm7, %v575_v43, %v569_v26  ;;  %v599_v48 = vld [vmem:[#allocation2 + $0x78] sm:$0xff]  ;;  %v598_v51 = vld [vmem:[#allocation2 + $0x70] sm:$0xff] }
 0x24e   :  { %582 = vst [vmem:[#allocation2 + $0x90] sm:$0xf] %v576_v46  ;;  %583 = vst [vmem:[#allocation2 + $0x98] sm:$0xf] %v579_v47  ;;  %680 = vmatprep.subr.bf16.mxu0 %v649_v44  ;;  %v639_v6 = vmul.f32 %v599_v48, %v1082_v10  ;;  %v638_v19 = vmul.f32 %v598_v51, %v1087_v13  ;;  %v622_v13 = vld [vmem:[%s1279_s5 + $0x90] sm:$0xf] }
 0x24f   :  { %681 = vmatpush1.bf16.msra.mxu0 %v648_v45 }
 0x250   :  { %v651_v50 = vpack.c.bf16 %v639_v6, %v635_v54  ;;  %v650_v52 = vpack.c.bf16 %v638_v19, %v634_v9 }
 0x251   :  { %v601_v53 = vld [vmem:[#allocation2 + $0x88] sm:$0xf]  ;;  %v600_v56 = vld [vmem:[#allocation2 + $0x80] sm:$0xf] }
 0x252   :  { %721 = vmatprep.subr.bf16.mxu1 %v651_v50  ;;  %v641_v55 = vmul.f32 %v621_v49, %v601_v53  ;;  %v640_v10 = vmul.f32 %v620_v7, %v600_v56 }
 0x253   :  { %722 = vmatpush1.bf16.msra.mxu1 %v650_v52 }
 0x254   :  { %v653_v57 = vpack.c.bf16 %v641_v55, %v641_v55  ;;  %v652_v59 = vpack.c.bf16 %v640_v10, %v640_v10 }
 0x255   :  { %v603_v58 = vld [vmem:[#allocation2 + $0x98] sm:$0xf]  ;;  %v602_v8 = vld [vmem:[#allocation2 + $0x90] sm:$0xf] }
 0x256   :  { %786 = vmatprep.subr.msk.bf16.mxu0 %vm305_vm8, %v653_v57  ;;  %v667_v12 = vsel %vm305_vm8, %v652_v59, 0  ;;  %v643_v14 = vmul.f32 %v623_v5, %v603_v58  ;;  %v642_v15 = vmul.f32 %v622_v13, %v602_v8  ;;  %v661_v18 = vpop.permute.xlu0 %660 }
 0x257   :  { %683 = vmatpush1.bf16.msra.mxu0 %v667_v12 }
 0x258   :  { %v655_v11 = vpack.c.bf16 %v643_v14, %v643_v14  ;;  %v654_v16 = vpack.c.bf16 %v642_v15, %v642_v15 }
 0x25a   :  { %787 = vmatmul.mubr.msk.bf16.vlgmr.msra.gmra.mrb[4].mxu0 %vm301_vm9, %v656_v60  ;;  %788 = vmatprep.subr.msk.bf16.mxu1 %vm305_vm8, %v655_v11  ;;  %v673_v17 = vsel %vm305_vm8, %v654_v16, 0 }
 0x25b   :  { %724 = vmatpush1.bf16.msra.mxu1 %v673_v17 }
 0x25e   :  { %789 = vmatmul.mubr.msk.bf16.vlgmr.msra.gmra.mrb[4].mxu1 %vm301_vm9, %v656_v60 }
 0x32d   :  { %v712_v61 = vpop.f32.mrb[4].mxu0 }
 0x32e   :  { %v713_v62 = vadd.f32 %v712_v61, %v661_v18  ;;  %v714_v63 = vpop.f32.mrb[5].mxu0 }
 0x32f   :  { %v715_v20 = vadd.f32 %v714_v63, %v661_v18  ;;  %v716_v21 = vpop.f32.mrb[6].mxu0 }
 0x330   :  { %v760_v22 = vadd.f32 %v713_v62, %v854_v1  ;;  %v717_v23 = vpop.f32.mrb[7].mxu0 }
 0x331   :  { %v761_v24 = vadd.f32 %v715_v20, %v868_v3  ;;  %v753_v25 = vpop.f32.mrb[4].mxu1 }
 0x332   :  { %v764_v26 = vmax.f32 %v760_v22, 0.0  ;;  %v754_v27 = vadd.f32 %v753_v25, %v661_v18  ;;  %v755_v28 = vpop.f32.mrb[5].mxu1 }
 0x333   :  { %v765_v29 = vmax.f32 %v761_v24, 0.0  ;;  %v756_v4 = vadd.f32 %v755_v28, %v661_v18  ;;  %v757_v30 = vpop.f32.mrb[6].mxu1 }
 0x334   :  { %v762_v31 = vadd.f32 %v754_v27, %v849_v0  ;;  %v758_v32 = vpop.f32.mrb[7].mxu1 }
 0x335   :  { %v772_v33 = vcombine.low %v764_v26, %v765_v29  ;;  %v763_v34 = vadd.f32 %v756_v4, %v864_v2 }
 0x336   :  { %v766_v35 = vmax.f32 %v762_v31, 0.0 }
 0x337   :  { %776 = vst [vmem:[%s1283_s6] sm:$0xff] %v772_v33  ;;  %v767_v1 = vmax.f32 %v763_v34, 0.0 }
 0x339   :  { %v773_v3 = vcombine.low %v766_v35, %v767_v1 }
 0x33b   :  { %777 = vst [vmem:[%s1283_s6 + $0x8] sm:$0xff] %v773_v3 }

</bundles_post_ra>
